<compile_context>
chip_gen: v5e
topology: v5e:2x2
jax: 0.10.0
libtpu: 0.0.40
codegen_flags: <defaults>
</compile_context>

<pallas_src>
import functools

import jax
import jax.numpy as jnp
from jax.experimental import pallas as pl
from jax.experimental.pallas import tpu as pltpu


def bnn_fwd_kernel(xt_ref, w1_ref, w2_ref, o_ref):
    """One grid step = Bb posterior samples x TILE_N data points.

    xt_ref: (d, TILE_N)      X^T tile (bf16), shared across sample blocks
    w1_ref: (Bb*h_pad, d)    packed layer-1 weights for Bb samples (bf16)
    w2_ref: (Bb*h_pad, 1)    packed layer-2 weights (f32), plain rows
    o_ref : (Bb, TILE_N)     sigmoid output (f32), N on lanes (dense stores)
    """
    bb, tile_n = o_ref.shape
    h_pad = w1_ref.shape[0] // bb

    # Layer 1: one wide MXU matmul (bf16 inputs, f32 accumulation), ReLU in f32.
    # NOTE: if the Mosaic dump ever shows a relayout of the lane-sparse
    # (Bb*h_pad, d) operand, repack W1 as (d, Bb*h_pad) and contract dim 0.
    hidden = jnp.dot(w1_ref[...], xt_ref[...],
                     preferred_element_type=jnp.float32)    # (Bb*h_pad, TILE_N)
    hidden = jnp.maximum(hidden, 0.0)

    # Layer 2 on the VPU: per-row scale by w2 (lane broadcast of the width-1
    # column) + grouped sublane sum over each sample's h_pad rows.
    weighted = hidden * w2_ref[...]                          # (Bb*h_pad, TILE_N)
    logits = jnp.sum(weighted.reshape(bb, h_pad, tile_n), axis=1)  # (Bb, TILE_N)

    # Sigmoid in f32; exp runs on the EUP, the exact divide on this small
    # (Bb, TILE_N) tile is negligible next to the matmul
    # (pl.reciprocal(..., approx=True) is the cheaper fallback if needed).
    o_ref[...] = 1.0 / (1.0 + jnp.exp(-logits))


def _round_up(x, m):
    return ((x + m - 1) // m) * m


_VMEM_BUDGET = 40 * 1024 * 1024   # per-step working-set budget (fits v7x 64 MiB)
_VMEM_LIMIT = 48 * 1024 * 1024    # scoped-VMEM cap passed to Mosaic


def _vmem_estimate(d, h_pad, bb, tile_n):
    """Rough per-step VMEM working set (bytes), with double-buffered IO."""
    interm = 2 * 4 * bb * h_pad * tile_n                # hidden + weighted (f32)
    xt_io = 2 * 2 * max(d, 8) * tile_n                  # bf16 X^T tile, 2 bufs
    out_io = 2 * 4 * bb * tile_n                        # f32 output tile, 2 bufs
    w_io = 2 * bb * h_pad * (2 * _round_up(d, 128) + 4 * 128)   # W1 + W2 blocks
    return interm + xt_io + out_io + w_io


def bnn_forward(X, W1, W2, *, block_b=8, tile_n=8192,
                matmul_dtype=jnp.bfloat16):
    """Pallas implementation of BNN.forward.

    X: (N, d), W1: (B, d, h), W2: (B, h, 1)  ->  (B, N, 1) float32
    """
    N, d = X.shape
    B, d2, h = W1.shape
    assert d == d2 and W2.shape == (B, h, 1)
    assert tile_n % 128 == 0 and block_b % 8 == 0

    Bb = block_b
    B_pad = _round_up(B, Bb)
    h_pad = _round_up(h, 8)   # keeps the grouped reduce a pure sublane regroup

    # Clamp tile_n so the per-step working set stays inside the VMEM budget
    # (v7x has only 64 MiB physical VMEM; v5e/v6e have 128 MiB).
    while tile_n > 128 and _vmem_estimate(d, h_pad, Bb, tile_n) > _VMEM_BUDGET:
        tile_n = max(128, (tile_n // 2 // 128) * 128)

    n128 = _round_up(N, 128)
    if n128 <= tile_n:
        TILE_N, N_pad = n128, n128
    else:
        TILE_N = tile_n
        N_pad = _round_up(N, TILE_N)

    # ---- one-time host-side layout prep (plain XLA, not the hot path) ----
    # X^T, zero-padded on N, cast to the MXU dtype (bf16 halves the dominant
    # HBM stream and doubles MXU rate; accumulation stays f32 in the kernel).
    xt = jnp.zeros((d, N_pad), matmul_dtype).at[:, :N].set(
        X.T.astype(matmul_dtype))
    # W1 packed as (B_pad*h_pad, d): row b*h_pad + k holds W1[b, :, k].
    w1p = jnp.zeros((B_pad, h_pad, d), matmul_dtype).at[:B, :h].set(
        jnp.transpose(W1, (0, 2, 1)).astype(matmul_dtype)
    ).reshape(B_pad * h_pad, d)
    # W2 packed as (B_pad*h_pad, 1) f32: row b*h_pad + k holds W2[b, k, 0].
    # Plain rows (no block-diagonal zeros) -- layer 2 now runs on the VPU.
    w2p = jnp.zeros((B_pad, h_pad), jnp.float32).at[:B, :h].set(
        W2[..., 0].astype(jnp.float32)
    ).reshape(B_pad * h_pad, 1)

    nt = N_pad // TILE_N     # number of N tiles
    nb = B_pad // Bb         # number of posterior-sample blocks
    if nt == 1 and nb > 1:
        # Only one N tile: lead with sample blocks so the leading "parallel"
        # axis has extent >= 2 for v7x megacore (X is read once either way).
        grid = (nb, nt)
        b_of = lambda g0, g1: g0
        n_of = lambda g0, g1: g1
    else:
        # N tiles outermost, sample blocks innermost: X^T is streamed from HBM
        # exactly once; only the small W1/W2 blocks are re-streamed per N tile.
        grid = (nt, nb)
        b_of = lambda g0, g1: g1
        n_of = lambda g0, g1: g0

    out = pl.pallas_call(
        bnn_fwd_kernel,
        out_shape=jax.ShapeDtypeStruct((B_pad, N_pad), jnp.float32),
        grid_spec=pltpu.PrefetchScalarGridSpec(
            num_scalar_prefetch=0,
            grid=grid,
            in_specs=[
                # X^T tile: shared across the sample-block axis.
                pl.BlockSpec((d, TILE_N), lambda g0, g1: (0, n_of(g0, g1))),
                # Layer-1 weights for this step's Bb samples.
                pl.BlockSpec((Bb * h_pad, d), lambda g0, g1: (b_of(g0, g1), 0)),
                # Layer-2 weights for the same Bb samples (plain rows, f32).
                pl.BlockSpec((Bb * h_pad, 1), lambda g0, g1: (b_of(g0, g1), 0)),
            ],
            # Lane-dense output block: Bb sublanes x TILE_N lanes.
            out_specs=pl.BlockSpec(
                (Bb, TILE_N), lambda g0, g1: (b_of(g0, g1), n_of(g0, g1))),
        ),
        compiler_params=pltpu.CompilerParams(
            # Both axes are independent (no reduction axis).
            dimension_semantics=("parallel", "parallel"),
            # <= v7x's 64 MiB physical VMEM; generous headroom on v5e/v6e.
            vmem_limit_bytes=_VMEM_LIMIT,
        ),
    )(xt, w1p, w2p)

    # Strip padding; restore the module's (B, N, 1) shape (free reshape).
    return out[:B, :N].reshape(B, N, 1)


def sample_weights(mu, p, epsilon, d, h):
    """Deterministic JAX port of BNN.sample_weights (glue, not the hot path)."""
    B = epsilon.shape[1]
    std = jnp.sqrt(jnp.log1p(jnp.exp(p)))            # sqrt(softplus(p))
    W = mu + std[:, None] * epsilon                  # (D, B)
    W1 = W[: d * h, :].T.reshape(B, d, h)
    W2 = W[d * h:, :].T.reshape(B, h, 1)
    return W1, W2


# TODO(synk): accuracy / predictive_likelihood / kl_div / ELBO stay as plain
# JAX reductions around this forward kernel (not worth a custom kernel).


if __name__ == "__main__":
    # Small shapes consistent with forward(); N and B deliberately not tile
    # multiples to exercise the padding paths.
    N, d, h, B = 200, 16, 32, 12
    total_num_weights = d * h + h * 1

    key = jax.random.PRNGKey(0)
    kx, keps = jax.random.split(key)

    X = jax.random.normal(kx, (N, d), dtype=jnp.float32)

    # BNN.__init__ parameters, deterministic: mu = zeros, p = ones.
    mu = jnp.zeros((total_num_weights, 1), dtype=jnp.float32)
    p = jnp.ones((total_num_weights,), dtype=jnp.float32)

    # BNN.sample_epsilon + sample_weights (plain-JAX glue).
    epsilon = jax.random.normal(keps, (total_num_weights, B), dtype=jnp.float32)
    W1, W2 = sample_weights(mu, p, epsilon, d, h)

    # Reference mirroring the kernel numerics: bf16 matmul inputs, f32
    # accumulation / elementwise, f32 second layer.
    Xb = X.astype(jnp.bfloat16)
    W1b = W1.astype(jnp.bfloat16)
    hidden_ref = jnp.maximum(
        jnp.einsum("nd,bdh->bnh", Xb, W1b,
                   preferred_element_type=jnp.float32), 0.0)
    logits_ref = jnp.einsum("bnh,bho->bno", hidden_ref,
                            W2.astype(jnp.float32),
                            preferred_element_type=jnp.float32)
    ref = 1.0 / (1.0 + jnp.exp(-logits_ref))

    # 1) Default (big-tile) config: single N tile, sample-block-leading grid.
    fwd = jax.jit(bnn_forward)
    out = jax.block_until_ready(fwd(X, W1, W2))
    assert out.shape == (B, N, 1)
    assert jnp.allclose(out, ref, atol=5e-4), "mismatch vs reference (default)"

    # 2) Small-tile config: exercises the N-tile-leading grid and N padding.
    fwd_small = jax.jit(functools.partial(bnn_forward, tile_n=128))
    out2 = jax.block_until_ready(fwd_small(X, W1, W2))
    assert out2.shape == (B, N, 1)
    assert jnp.allclose(out2, ref, atol=5e-4), "mismatch vs reference (tiled)"

    print("KERNEL_OK")
</pallas_src>

<mosaic_0001>
module attributes {stable_mosaic.version = 11 : i64} {
  func.func @bnn_fwd_kernel(%arg0: i32, %arg1: i32, %arg2: memref<16x256xbf16, #tpu.memory_space<vmem>>, %arg3: memref<256x16xbf16, #tpu.memory_space<vmem>>, %arg4: memref<256x1xf32, #tpu.memory_space<vmem>>, %arg5: memref<8x256xf32, #tpu.memory_space<vmem>>) attributes {dimension_semantics = [#tpu.dimension_semantics<parallel>, #tpu.dimension_semantics<parallel>], iteration_bounds = array<i64: 2, 1>, scalar_prefetch = 0 : i64, scratch_operands = 0 : i64, tpu.core_type = #tpu.core_type<tc>, window_params = [{transform_indices = @transform_0, window_bounds = array<i64: 16, 256>}, {transform_indices = @transform_1, window_bounds = array<i64: 256, 16>}, {transform_indices = @transform_2, window_bounds = array<i64: 256, 1>}, {transform_indices = @transform_3, window_bounds = array<i64: 8, 256>}]} {
    %c0 = arith.constant 0 : index
    %c0_0 = arith.constant 0 : index
    %0 = vector.load %arg3[%c0, %c0_0] : memref<256x16xbf16, #tpu.memory_space<vmem>>, vector<256x16xbf16>
    %c0_1 = arith.constant 0 : index
    %c0_2 = arith.constant 0 : index
    %1 = vector.load %arg2[%c0_1, %c0_2] : memref<16x256xbf16, #tpu.memory_space<vmem>>, vector<16x256xbf16>
    %cst = arith.constant dense<0.000000e+00> : vector<256x256xf32>
    %2 = tpu.matmul %0, %1, %cst {dimension_numbers = #tpu.dot_dimension_numbers<[1], [0], [0], [1], [0, 0, 1, 1], [], []>} : vector<256x16xbf16>, vector<16x256xbf16>, vector<256x256xf32> -> vector<256x256xf32>
    %cst_3 = arith.constant 0.000000e+00 : f32
    %3 = vector.broadcast %cst_3 : f32 to vector<256x256xf32>
    %4 = arith.maximumf %2, %3 : vector<256x256xf32>
    %c0_4 = arith.constant 0 : index
    %c0_5 = arith.constant 0 : index
    %5 = vector.load %arg4[%c0_4, %c0_5] : memref<256x1xf32, #tpu.memory_space<vmem>>, vector<256x1xf32>
    %6 = vector.broadcast %5 : vector<256x1xf32> to vector<256x256xf32>
    %7 = arith.mulf %4, %6 : vector<256x256xf32>
    %8 = vector.shape_cast %7 : vector<256x256xf32> to vector<8x32x256xf32>
    %cst_6 = arith.constant dense<0.000000e+00> : vector<8x256xf32>
    %9 = vector.multi_reduction <add>, %8, %cst_6 [1] : vector<8x32x256xf32> to vector<8x256xf32>
    %cst_7 = arith.constant 0.000000e+00 : f32
    %10 = vector.broadcast %cst_7 : f32 to vector<8x256xf32>
    %11 = arith.subf %10, %9 : vector<8x256xf32>
    %12 = math.exp %11 : vector<8x256xf32>
    %cst_8 = arith.constant 1.000000e+00 : f32
    %13 = vector.broadcast %cst_8 : f32 to vector<8x256xf32>
    %14 = arith.addf %13, %12 : vector<8x256xf32>
    %cst_9 = arith.constant 1.000000e+00 : f32
    %15 = vector.broadcast %cst_9 : f32 to vector<8x256xf32>
    %16 = arith.divf %15, %14 : vector<8x256xf32>
    %c0_10 = arith.constant 0 : index
    %c0_11 = arith.constant 0 : index
    %17 = vector.load %arg5[%c0_10, %c0_11] : memref<8x256xf32, #tpu.memory_space<vmem>>, vector<8x256xf32>
    tpu.vector_store %arg5[%c0_10, %c0_11], %16 {strides = array<i32>} : memref<8x256xf32, #tpu.memory_space<vmem>>, vector<8x256xf32>,
    return
  }
  func.func @transform_0(%arg0: i32, %arg1: i32) -> (i32, i32) {
    %c0_i32 = arith.constant 0 : i32
    %c0_i32_0 = arith.constant 0 : i32
    return %c0_i32, %arg1 : i32, i32
  }
  func.func @transform_1(%arg0: i32, %arg1: i32) -> (i32, i32) {
    %c0_i32 = arith.constant 0 : i32
    %c0_i32_0 = arith.constant 0 : i32
    return %arg0, %c0_i32 : i32, i32
  }
  func.func @transform_2(%arg0: i32, %arg1: i32) -> (i32, i32) {
    %c0_i32 = arith.constant 0 : i32
    %c0_i32_0 = arith.constant 0 : i32
    return %arg0, %c0_i32 : i32, i32
  }
  func.func @transform_3(%arg0: i32, %arg1: i32) -> (i32, i32) {
    %c0_i32 = arith.constant 0 : i32
    return %arg0, %arg1 : i32, i32
  }
}

</mosaic_0001>

<bundles_post_ra>
// kernel: bnn_forward.1
= control target key start
LH: loop header
LB: loop body
LE: loop exit
PB: predicated region body
PF: predicated region fallthrough
CT: control target
= control target key end

     0   :  { %s1785_s12 = smov 0   ;;  %s1787_s13 = smov 0   ;;  %s2426_s0 = inlined_call_operand.vmem [shape: bf16[16,256], index: 0, kind: input, shape index: {}]   ;;  %s2427_s1 = inlined_call_operand.vmem [shape: bf16[512,16], index: 1, kind: input, shape index: {}]   ;;  %s2428_s2 = inlined_call_operand.vmem [shape: f32[512,1], index: 2, kind: input, shape index: {}]   ;;  %s2429_s3 = inlined_call_operand.vmem [shape: f32[16,256], index: 3, kind: output, shape index: {}]  }
   0x1   :  { %s1789_s14 = smov 0  }
   0x2 LB: > { %s25_s15 = sadd.s32 1, %s1758_s13  ;;  %p1514_p0 = scmp.ge.s32.totalorder %s1762_s14, 1  ;;  %s1762_s14 = sphi %s1789_s14, %s13_s14   ;;  %s1758_s13 = sphi %s1787_s13, %s2465_s13   ;;  %s1754_s12 = sphi %s1785_s12, %s2464_s12  }
   0x3   : > { %p27_p1 = scmp.ge.s32.totalorder %s25_s15, 2  ;;  %p174_p2 = scmp.lt.s32.totalorder %s1762_s14, 3 }
   0x5   : > { %s2467_s15 = smov (%p27_p1, %s25_s15), 0  ;;  %p175_p3 = pnand %p1514_p0, %p174_p2 }
   0x6   : > { %s1515_s20 = sshll.u32 (!%p175_p3), %s1754_s12, 5  ;;  %p231_p5 = scmp.lt.s32.totalorder (!%p175_p3), %s1754_s12, 1 }
   0x7   : > { %178 = sbr.rel (%p175_p3) target bundleno = 324 (0x144), region = 32  ;;  %p219_p4 = scmp.lt.s32.totalorder (!%p175_p3), %s1515_s20, 63 }
   0xc   : > { %v1587_v0 = vld [vmem:[%s2426_s0] sm:$0xf]  ;;  %v1645_v1 = vld [vmem:[%s2426_s0 + $0x4] sm:$0xf0]  ;;  %v1764_v2 = vmov 0   ;;  %s2469_s20 = smov (!%p219_p4, %s1515_s20), 63 }
   0xd   : > { %1674 = vset.pattern.permute.xlu1 %v1764_v2  ;;  %1673 = vset.pattern.permute.xlu0 %v1764_v2  ;;  %v1588_v3 = vor.u32 %v1645_v1, %v1587_v0  ;;  %v1644_v4 = vld [vmem:[%s2426_s0 + $0x4] sm:$0xf]  ;;  %v1589_v5 = vld [vmem:[%s2426_s0 + $0x8] sm:$0xf0]  ;;  %s1518_s25 = sshll.u32 %s2469_s20, 3  ;;  %s1516_s26 = sshll.u32 %s2469_s20, 2 }
   0xe   : > { %v1592_v6 = vor.u32 %v1644_v4, %v1589_v5  ;;  %1675 = vset.pattern.permute.xlu2 %v1764_v2  ;;  %s1821_s29 = scalar_lea.vmem %s2428_s2, %s1518_s25  ;;  %s1826_s5 = scalar_lea.vmem %s2427_s1, %s1516_s26  ;;  %vm365_vm0 = vcmask 130048   ;;  %vm1376_vm7 = vcmask 1041409  }
   0xf   : > { %421 = vmatpush.bf16.msra.mxu0 %v1588_v3  ;;  %1646 = vmatpush.bf16.msra.mxu2 %v1588_v3  ;;  %v658_v7 = vld [vmem:[%s1821_s29 + $0x10] sm:$0xff]  ;;  %v656_v8 = vld [vmem:[%s1821_s29] sm:$0xff]  ;;  %v659_v12 = vld [vmem:[%s1821_s29 + $0x18] sm:$0xff]  ;;  %s2471_s12 = smov (!%p231_p5, %s1754_s12), 1 }
  0x10   : > { %510 = vmatpush.bf16.msra.mxu1 %v1592_v6  ;;  %1647 = vmatpush.bf16.msra.mxu3 %v1592_v6  ;;  %v1628_v9 = vld [vmem:[%s1826_s5] sm:$0xff]  ;;  %v657_v13 = vld [vmem:[%s1821_s29 + $0x8] sm:$0xff]  ;;  %v663_v15 = vld [vmem:[%s1821_s29 + $0x38] sm:$0xff]  ;;  %s1627_s6 = sshll.u32 %s2471_s12, 4 }
  0x11   : > { %700 = vperm.xlu1 %1674, %v658_v7   ;;  %690 = vperm.xlu0 %1673, %v656_v8   ;;  %v1636_v10 = vld [vmem:[%s1826_s5 + $0x40] sm:$0xff]  ;;  %v661_v14 = vld [vmem:[%s1821_s29 + $0x28] sm:$0xff]  ;;  %v662_v16 = vld [vmem:[%s1821_s29 + $0x30] sm:$0xff]  ;;  %s238_s9 = scalar_lea.vmem %s2429_s3, %s1627_s6 }
  0x12   : > { %v660_v11 = vld [vmem:[%s1821_s29 + $0x20] sm:$0xff]  ;;  %1593 = vmatmul.msk.bf16.vlgmr.msra.gmra.mxu0 %vm365_vm0, %v1628_v9  ;;  %1601 = vmatmul.msk.bf16.vlgmr.msra.gmra.mxu2 %vm365_vm0, %v1636_v10  ;;  %v1629_v17 = vld [vmem:[%s1826_s5 + $0x8] sm:$0xff]  ;;  %v666_v20 = vld [vmem:[%s1821_s29 + $0x50] sm:$0xff] }
  0x13   : > { %1609 = vmatmul.msk.bf16.vlgmr.msra.gmra.mxu1 %vm365_vm0, %v1628_v9  ;;  %1617 = vmatmul.msk.bf16.vlgmr.msra.gmra.mxu3 %vm365_vm0, %v1636_v10  ;;  %v1637_v18 = vld [vmem:[%s1826_s5 + $0x48] sm:$0xff]  ;;  %v664_v19 = vld [vmem:[%s1821_s29 + $0x40] sm:$0xff]  ;;  %v667_v22 = vld [vmem:[%s1821_s29 + $0x58] sm:$0xff] }
  0x14   : > { %710 = vperm.xlu2 %1675, %v660_v11   ;;  %v665_v21 = vld [vmem:[%s1821_s29 + $0x48] sm:$0xff]  ;;  %v668_v24 = vld [vmem:[%s1821_s29 + $0x60] sm:$0xff]  ;;  %v1630_v25 = vld [vmem:[%s1826_s5 + $0x10] sm:$0xff] }
  0x15   : > { %v669_v23 = vld [vmem:[%s1821_s29 + $0x68] sm:$0xff]  ;;  %v1638_v26 = vld [vmem:[%s1826_s5 + $0x50] sm:$0xff]  ;;  %v672_v28 = vld [vmem:[%s1821_s29 + $0x80] sm:$0xff] }
  0x16   : > { %v670_v27 = vld [vmem:[%s1821_s29 + $0x70] sm:$0xff]  ;;  %v671_v29 = vld [vmem:[%s1821_s29 + $0x78] sm:$0xff]  ;;  %v673_v30 = vld [vmem:[%s1821_s29 + $0x88] sm:$0xff] }
  0x17   : > { %v677_v31 = vld [vmem:[%s1821_s29 + $0xa8] sm:$0xff]  ;;  %v676_v32 = vld [vmem:[%s1821_s29 + $0xa0] sm:$0xff]  ;;  %v1631_v33 = vld [vmem:[%s1826_s5 + $0x18] sm:$0xff] }
  0x18   : > { %v1639_v34 = vld [vmem:[%s1826_s5 + $0x58] sm:$0xff]  ;;  %v674_v35 = vld [vmem:[%s1821_s29 + $0x90] sm:$0xff]  ;;  %v681_v36 = vld [vmem:[%s1821_s29 + $0xc8] sm:$0xff] }
  0x19   : > { %705 = vperm.xlu1 %1674, %v659_v12   ;;  %695 = vperm.xlu0 %1673, %v657_v13   ;;  %v680_v37 = vld [vmem:[%s1821_s29 + $0xc0] sm:$0xff]  ;;  %v678_v38 = vld [vmem:[%s1821_s29 + $0xb0] sm:$0xff]  ;;  %v685_v39 = vld [vmem:[%s1821_s29 + $0xe8] sm:$0xff] }
  0x1a   : > { %v684_v40 = vld [vmem:[%s1821_s29 + $0xe0] sm:$0xff]  ;;  %v675_v43 = vld [vmem:[%s1821_s29 + $0x98] sm:$0xff]  ;;  %v682_v45 = vld [vmem:[%s1821_s29 + $0xd0] sm:$0xff] }
  0x1b   : > { %v1632_v41 = vld [vmem:[%s1826_s5 + $0x20] sm:$0xff]  ;;  %v679_v44 = vld [vmem:[%s1821_s29 + $0xb8] sm:$0xff]  ;;  %v686_v46 = vld [vmem:[%s1821_s29 + $0xf0] sm:$0xff] }
  0x1c   : > { %715 = vperm.xlu2 %1675, %v661_v14   ;;  %v1640_v42 = vld [vmem:[%s1826_s5 + $0x60] sm:$0xff]  ;;  %v687_v47 = vld [vmem:[%s1821_s29 + $0xf8] sm:$0xff]  ;;  %v1633_v49 = vld [vmem:[%s1826_s5 + $0x28] sm:$0xff] }
  0x1d   : > { %v683_v48 = vld [vmem:[%s1821_s29 + $0xd8] sm:$0xff]  ;;  %v1641_v50 = vld [vmem:[%s1826_s5 + $0x68] sm:$0xff]  ;;  %v1634_v52 = vld [vmem:[%s1826_s5 + $0x30] sm:$0xff] }
  0x1e   : > { %v1642_v53 = vld [vmem:[%s1826_s5 + $0x70] sm:$0xff]  ;;  %v1635_v56 = vld [vmem:[%s1826_s5 + $0x38] sm:$0xff] }
  0x1f   : > { %v1643_v57 = vld [vmem:[%s1826_s5 + $0x78] sm:$0xff] }
  0x21   : > { %725 = vperm.xlu1 %1674, %v663_v15   ;;  %720 = vperm.xlu0 %1673, %v662_v16  }
  0x22   : > { %1594 = vmatmul.msk.bf16.gmra.mxu0 %vm365_vm0, %v1629_v17  ;;  %1602 = vmatmul.msk.bf16.gmra.mxu2 %vm365_vm0, %v1637_v18 }
  0x23   : > { %1610 = vmatmul.msk.bf16.gmra.mxu1 %vm365_vm0, %v1629_v17  ;;  %1618 = vmatmul.msk.bf16.gmra.mxu3 %vm365_vm0, %v1637_v18 }
  0x24   : > { %730 = vperm.xlu2 %1675, %v664_v19  }
  0x29   : > { %740 = vperm.xlu1 %1674, %v666_v20   ;;  %735 = vperm.xlu0 %1673, %v665_v21  }
  0x2c   : > { %745 = vperm.xlu2 %1675, %v667_v22  }
  0x31   : > { %755 = vperm.xlu1 %1674, %v669_v23   ;;  %750 = vperm.xlu0 %1673, %v668_v24  }
  0x32   : > { %1595 = vmatmul.msk.bf16.gmra.mxu0 %vm365_vm0, %v1630_v25  ;;  %1603 = vmatmul.msk.bf16.gmra.mxu2 %vm365_vm0, %v1638_v26 }
  0x33   : > { %1611 = vmatmul.msk.bf16.gmra.mxu1 %vm365_vm0, %v1630_v25  ;;  %1619 = vmatmul.msk.bf16.gmra.mxu3 %vm365_vm0, %v1638_v26 }
  0x34   : > { %760 = vperm.xlu2 %1675, %v670_v27  }
  0x39   : > { %770 = vperm.xlu1 %1674, %v672_v28   ;;  %765 = vperm.xlu0 %1673, %v671_v29  }
  0x3c   : > { %775 = vperm.xlu2 %1675, %v673_v30  }
  0x41   : > { %795 = vperm.xlu1 %1674, %v677_v31   ;;  %790 = vperm.xlu0 %1673, %v676_v32  }
  0x42   : > { %1596 = vmatmul.msk.bf16.gmra.mxu0 %vm365_vm0, %v1631_v33  ;;  %1604 = vmatmul.msk.bf16.gmra.mxu2 %vm365_vm0, %v1639_v34 }
  0x43   : > { %1612 = vmatmul.msk.bf16.gmra.mxu1 %vm365_vm0, %v1631_v33  ;;  %1620 = vmatmul.msk.bf16.gmra.mxu3 %vm365_vm0, %v1639_v34 }
  0x44   : > { %780 = vperm.xlu2 %1675, %v674_v35  }
  0x49   : > { %815 = vperm.xlu1 %1674, %v681_v36   ;;  %810 = vperm.xlu0 %1673, %v680_v37  }
  0x4c   : > { %800 = vperm.xlu2 %1675, %v678_v38  }
  0x51   : > { %835 = vperm.xlu1 %1674, %v685_v39   ;;  %830 = vperm.xlu0 %1673, %v684_v40  }
  0x52   : > { %1597 = vmatmul.msk.bf16.gmra.mxu0 %vm365_vm0, %v1632_v41  ;;  %1605 = vmatmul.msk.bf16.gmra.mxu2 %vm365_vm0, %v1640_v42 }
  0x53   : > { %1613 = vmatmul.msk.bf16.gmra.mxu1 %vm365_vm0, %v1632_v41  ;;  %1621 = vmatmul.msk.bf16.gmra.mxu3 %vm365_vm0, %v1640_v42 }
  0x54   : > { %785 = vperm.xlu2 %1675, %v675_v43  }
  0x59   : > { %805 = vperm.xlu1 %1674, %v679_v44   ;;  %820 = vperm.xlu0 %1673, %v682_v45  }
  0x5c   : > { %840 = vperm.xlu2 %1675, %v686_v46  }
  0x61   : > { %845 = vperm.xlu1 %1674, %v687_v47   ;;  %825 = vperm.xlu0 %1673, %v683_v48  }
  0x62   : > { %1598 = vmatmul.msk.bf16.gmra.mxu0 %vm365_vm0, %v1633_v49  ;;  %1606 = vmatmul.msk.bf16.gmra.mxu2 %vm365_vm0, %v1641_v50 }
  0x63   : > { %1614 = vmatmul.msk.bf16.gmra.mxu1 %vm365_vm0, %v1633_v49  ;;  %1622 = vmatmul.msk.bf16.gmra.mxu3 %vm365_vm0, %v1641_v50 }
  0x6e   : > { %v1896_v51 = vpop.permute.xlu2 %710 }
  0x72   : > { %1599 = vmatmul.msk.bf16.gmra.mxu0 %vm365_vm0, %v1634_v52  ;;  %1607 = vmatmul.msk.bf16.gmra.mxu2 %vm365_vm0, %v1642_v53 }
  0x73   : > { %1615 = vmatmul.msk.bf16.gmra.mxu1 %vm365_vm0, %v1634_v52  ;;  %1623 = vmatmul.msk.bf16.gmra.mxu3 %vm365_vm0, %v1642_v53 }
  0x76   : > { %v1904_v54 = vpop.permute.xlu2 %715 }
  0x7e   : > { %v1906_v55 = vpop.permute.xlu2 %730 }
  0x82   : > { %1600 = vmatmul.msk.bf16.gmra.mxu0 %vm365_vm0, %v1635_v56  ;;  %1608 = vmatmul.msk.bf16.gmra.mxu2 %vm365_vm0, %v1643_v57 }
  0x83   : > { %1616 = vmatmul.msk.bf16.gmra.mxu1 %vm365_vm0, %v1635_v56  ;;  %v701_v58 = vpop.permute.xlu1 %700  ;;  %v691_v59 = vpop.permute.xlu0 %690  ;;  %1624 = vmatmul.msk.bf16.gmra.mxu3 %vm365_vm0, %v1643_v57 }
  0x86   : > { %v1914_v60 = vpop.permute.xlu2 %745 }
  0x8b   : > { %v706_v61 = vpop.permute.xlu1 %705  ;;  %v696_v62 = vpop.permute.xlu0 %695 }
  0x8e   : > { %v1916_v63 = vpop.permute.xlu2 %760 }
  0x8f   : > { %v423_v0 = vpop.f32.mrf.mxu0 }
  0x90   : > { %v512_v1 = vpop.f32.mrf.mxu1  ;;  %v592_v2 = vmax.f32 %v423_v0, 0.0 }
  0x91   : > { %v593_v3 = vmax.f32 %v512_v1, 0.0 }
  0x92   : > { %v848_v4 = vmul.f32 %v691_v59, %v592_v2 }
  0x93   : > { %v849_v5 = vmul.f32 %v691_v59, %v593_v3  ;;  %v1918_v6 = vpop.permute.xlu1 %725  ;;  %v1920_v7 = vpop.permute.xlu0 %720 }
  0x95   : > { %v463_v8 = vpop.f32.mrf.mxu2 }
  0x96   : > { %v552_v9 = vpop.f32.mrf.mxu3  ;;  %v776_v10 = vpop.permute.xlu2 %775  ;;  %v624_v43 = vmax.f32 %v463_v8, 0.0 }
  0x97   : > { %v425_v11 = vpop.f32.mrf.mxu0  ;;  %v625_v44 = vmax.f32 %v552_v9, 0.0 }
  0x98   : > { %v594_v12 = vmax.f32 %v425_v11, 0.0  ;;  %v514_v13 = vpop.f32.mrf.mxu1 }
  0x99   : > { %v595_v14 = vmax.f32 %v514_v13, 0.0 }
  0x9a   : > { %v850_v15 = vmul.f32 %v696_v62, %v594_v12 }
  0x9b   : > { %v851_v16 = vmul.f32 %v696_v62, %v595_v14  ;;  %v1922_v17 = vpop.permute.xlu1 %740  ;;  %v1924_v26 = vpop.permute.xlu0 %735 }
  0x9c   : > { %v912_v18 = vadd.f32 %v850_v15, %v848_v4 }
  0x9d   : > { %v921_v19 = vadd.f32 %v851_v16, %v849_v5  ;;  %v465_v20 = vpop.f32.mrf.mxu2 }
  0x9e   : > { %v554_v21 = vpop.f32.mrf.mxu3  ;;  %v781_v22 = vpop.permute.xlu2 %780  ;;  %v626_v35 = vmax.f32 %v465_v20, 0.0 }
  0x9f   : > { %v428_v23 = vpop.f32.mrf.mxu0  ;;  %v627_v38 = vmax.f32 %v554_v21, 0.0 }
  0xa0   : > { %v596_v24 = vmax.f32 %v428_v23, 0.0  ;;  %v517_v25 = vpop.f32.mrf.mxu1  ;;  %v882_v47 = vmul.f32 %v776_v10, %v626_v35 }
  0xa1   : > { %v597_v27 = vmax.f32 %v517_v25, 0.0  ;;  %v883_v52 = vmul.f32 %v776_v10, %v627_v38 }
  0xa2   : > { %v852_v28 = vmul.f32 %v701_v58, %v596_v24 }
  0xa3   : > { %v853_v29 = vmul.f32 %v701_v58, %v597_v27  ;;  %v1926_v30 = vpop.permute.xlu1 %755  ;;  %v1930_v48 = vpop.permute.xlu0 %750 }
  0xa4   : > { %v913_v31 = vadd.f32 %v912_v18, %v852_v28 }
  0xa5   : > { %v922_v32 = vadd.f32 %v921_v19, %v853_v29  ;;  %v468_v33 = vpop.f32.mrf.mxu2 }
  0xa6   : > { %v557_v34 = vpop.f32.mrf.mxu3  ;;  %v1928_v36 = vpop.permute.xlu2 %800  ;;  %v628_v41 = vmax.f32 %v468_v33, 0.0 }
  0xa7   : > { %v430_v37 = vpop.f32.mrf.mxu0  ;;  %v629_v45 = vmax.f32 %v557_v34, 0.0 }
  0xa8   : > { %v598_v39 = vmax.f32 %v430_v37, 0.0  ;;  %v519_v40 = vpop.f32.mrf.mxu1  ;;  %v884_v58 = vmul.f32 %v781_v22, %v628_v41 }
  0xa9   : > { %v599_v42 = vmax.f32 %v519_v40, 0.0  ;;  %v885_v62 = vmul.f32 %v781_v22, %v629_v45 }
  0xaa   : > { %v854_v46 = vmul.f32 %v706_v61, %v598_v39 }
  0xab   : > { %v855_v49 = vmul.f32 %v706_v61, %v599_v42  ;;  %v771_v50 = vpop.permute.xlu1 %770 }
  0xac   : > { %v914_v53 = vadd.f32 %v913_v31, %v854_v46  ;;  %v880_v56 = vmul.f32 %v771_v50, %v624_v43  ;;  %v881_v57 = vmul.f32 %v771_v50, %v625_v44  ;;  %v1934_v31 = vpop.permute.xlu0 %765 }
  0xad   : > { %v923_v59 = vadd.f32 %v922_v32, %v855_v49  ;;  %v470_v3 = vpop.f32.mrf.mxu2 }
  0xae   : > { %v915_v0 = vrot.slane %v914_v53, 4  ;;  %v984_v1 = vadd.f32 %v882_v47, %v880_v56  ;;  %v993_v2 = vadd.f32 %v883_v52, %v881_v57  ;;  %v559_v4 = vpop.f32.mrf.mxu3  ;;  %v630_v8 = vmax.f32 %v470_v3, 0.0  ;;  %v786_v11 = vpop.permute.xlu2 %785 }
  0xaf   : > { %v924_v5 = vrot.slane %v923_v59, 4  ;;  %v631_v9 = vmax.f32 %v559_v4, 0.0  ;;  %v433_v12 = vpop.f32.mrf.mxu0 }
  0xb0   : > { %v916_v13 = vadd.f32 %v915_v0, %v914_v53  ;;  %v985_v61 = vadd.f32 %v984_v1, %v884_v58  ;;  %v994_v14 = vadd.f32 %v993_v2, %v885_v62  ;;  %v600_v10 = vmax.f32 %v433_v12, 0.0  ;;  %v522_v15 = vpop.f32.mrf.mxu1 }
  0xb1   : > { %v925_v16 = vadd.f32 %v924_v5, %v923_v59  ;;  %v886_v18 = vmul.f32 %v786_v11, %v630_v8  ;;  %v887_v19 = vmul.f32 %v786_v11, %v631_v9  ;;  %v601_v20 = vmax.f32 %v522_v15, 0.0 }
  0xb2   : > { %v917_v21 = vrot.slane %v916_v13, 2  ;;  %v856_v22 = vmul.f32 %v1896_v51, %v600_v10 }
  0xb3   : > { %v926_v23 = vrot.slane %v925_v16, 2  ;;  %v986_v24 = vadd.f32 %v985_v61, %v886_v18  ;;  %v995_v25 = vadd.f32 %v994_v14, %v887_v19  ;;  %v857_v27 = vmul.f32 %v1896_v51, %v601_v20  ;;  %v796_v32 = vpop.permute.xlu1 %795 }
  0xb4   : > { %v918_v28 = vadd.f32 %v917_v21, %v916_v13  ;;  %v791_v57 = vpop.permute.xlu0 %790 }
  0xb5   : > { %v927_v29 = vadd.f32 %v926_v23, %v925_v16  ;;  %v473_v33 = vpop.f32.mrf.mxu2  ;;  %v987_v44 = vrot.slane %v986_v24, 4  ;;  %v996_v56 = vrot.slane %v995_v25, 4 }
  0xb6   : > { %v562_v34 = vpop.f32.mrf.mxu3  ;;  %v919_v37 = vrot.slane %v918_v28, 1  ;;  %v632_v47 = vmax.f32 %v473_v33, 0.0 }
  0xb7   : > { %v435_v35 = vpop.f32.mrf.mxu0  ;;  %v928_v40 = vrot.slane %v927_v29, 1  ;;  %v633_v49 = vmax.f32 %v562_v34, 0.0  ;;  %v988_v0 = vadd.f32 %v987_v44, %v986_v24  ;;  %v997_v15 = vadd.f32 %v996_v56, %v995_v25 }
  0xb8   : > { %v602_v38 = vmax.f32 %v435_v35, 0.0  ;;  %v524_v39 = vpop.f32.mrf.mxu1  ;;  %v920_v43 = vadd.f32 %v919_v37, %v918_v28  ;;  %v888_v8 = vmul.f32 %v791_v57, %v632_v47 }
  0xb9   : > { %v603_v42 = vmax.f32 %v524_v39, 0.0  ;;  %v929_v46 = vadd.f32 %v928_v40, %v927_v29  ;;  %v889_v11 = vmul.f32 %v791_v57, %v633_v49  ;;  %v989_v20 = vrot.slane %v988_v0, 2 }
  0xba   : > { %v858_v41 = vmul.f32 %v1904_v54, %v602_v38  ;;  %v1056_v62 = vsub.f32 0.0, %v920_v43 }
  0xbb   : > { %v859_v51 = vmul.f32 %v1904_v54, %v603_v42  ;;  %v1938_v1 = vpop.permute.xlu1 %815  ;;  %v1057_v5 = vsub.f32 0.0, %v929_v46  ;;  %v990_v29 = vadd.f32 %v989_v20, %v988_v0 }
  0xbc   : > { %v930_v45 = vadd.f32 %v858_v41, %v856_v22  ;;  %v1072_v10 = vmul.f32 1.442695, %v1056_v62 }
  0xbd   : > { %v939_v50 = vadd.f32 %v859_v51, %v857_v27  ;;  %v475_v52 = vpop.f32.mrf.mxu2  ;;  %v1074_v19 = vmul.f32 1.442695, %v1057_v5  ;;  %v998_v27 = vrot.slane %v997_v15, 2  ;;  %v991_v38 = vrot.slane %v990_v29, 1 }
  0xbe   : > { %v564_v53 = vpop.f32.mrf.mxu3  ;;  %v634_v58 = vmax.f32 %v475_v52, 0.0  ;;  %1676 = vpow2.f32 %v1072_v10 }
  0xbf   : > { %v438_v59 = vpop.f32.mrf.mxu0  ;;  %v635_v2 = vmax.f32 %v564_v53, 0.0  ;;  %1678 = vpow2.f32 %v1074_v19  ;;  %v999_v39 = vadd.f32 %v998_v27, %v997_v15  ;;  %v992_v52 = vadd.f32 %v991_v38, %v990_v29 }
  0xc0   : > { %v604_v3 = vmax.f32 %v438_v59, 0.0  ;;  %v527_v4 = vpop.f32.mrf.mxu1  ;;  %v890_v54 = vmul.f32 %v796_v32, %v634_v58 }
  0xc1   : > { %v605_v9 = vmax.f32 %v527_v4, 0.0  ;;  %v891_v12 = vmul.f32 %v796_v32, %v635_v2  ;;  %v1957_v4 = vpop.permute.xlu0 %810 }
  0xc2   : > { %v860_v13 = vmul.f32 %v1920_v7, %v604_v3  ;;  %v1002_v61 = vadd.f32 %v890_v54, %v888_v8  ;;  %v1064_v3 = vsub.f32 0.0, %v992_v52 }
  0xc3   : > { %v861_v14 = vmul.f32 %v1920_v7, %v605_v9  ;;  %v1011_v16 = vadd.f32 %v891_v12, %v889_v11  ;;  %v1942_v34 = vpop.permute.xlu1 %835 }
  0xc4   : > { %v931_v18 = vadd.f32 %v930_v45, %v860_v13  ;;  %v1677_v42 = vpop.eup %1676 }
  0xc5   : > { %v940_v21 = vadd.f32 %v939_v50, %v861_v14  ;;  %v478_v22 = vpop.f32.mrf.mxu2  ;;  %v1679_v46 = vpop.eup %1678  ;;  %v1952_v50 = vadd.f32 1.0, %v1677_v42 }
  0xc6   : > { %v567_v23 = vpop.f32.mrf.mxu3  ;;  %v636_v32 = vmax.f32 %v478_v22, 0.0  ;;  %v1954_v53 = vadd.f32 1.0, %v1679_v46 }
  0xc7   : > { %v440_v24 = vpop.f32.mrf.mxu0  ;;  %v637_v33 = vmax.f32 %v567_v23, 0.0  ;;  %1680 = vrcp.f32 %v1952_v50  ;;  %v1129_v52 = vand.u32 2147483647, %v1952_v50  ;;  %vm1125_vm1 = vweird.f32 %v1952_v50 }
  0xc8   : > { %v529_v28 = vpop.f32.mrf.mxu1  ;;  %v606_v7 = vmax.f32 %v440_v24, 0.0  ;;  %v892_v25 = vmul.f32 %v1928_v36, %v636_v32  ;;  %1682 = vrcp.f32 %v1954_v53  ;;  %vm1140_vm4 = vweird.f32 %v1954_v53 }
  0xc9   : > { %v607_v35 = vmax.f32 %v529_v28, 0.0  ;;  %v893_v37 = vmul.f32 %v1928_v36, %v637_v33  ;;  %v1000_v36 = vrot.slane %v999_v39, 1  ;;  %vm2063_vm8 = vcmp.eq.f32.partialorder %v1129_v52, 8.507059e+37 }
  0xca   : > { %v1003_v40 = vadd.f32 %v1002_v61, %v892_v25  ;;  %v862_v43 = vmul.f32 %v1918_v6, %v606_v7 }
  0xcb   : > { %v1012_v41 = vadd.f32 %v1011_v16, %v893_v37  ;;  %v863_v44 = vmul.f32 %v1918_v6, %v607_v35  ;;  %v806_v6 = vpop.permute.xlu1 %805  ;;  %v1001_v2 = vadd.f32 %v1000_v36, %v999_v39  ;;  %v1088_v16 = vmul.f32 1.442695, %v1064_v3 }
  0xcc   : > { %v932_v56 = vadd.f32 %v931_v18, %v862_v43  ;;  %v1979_v43 = vpop.permute.xlu0 %830  ;;  %v1146_v36 = vand.u32 2147483648, %v1954_v53 }
  0xcd   : > { %v480_v45 = vpop.f32.mrf.mxu2  ;;  %v941_v57 = vadd.f32 %v940_v21, %v863_v44  ;;  %v1065_v15 = vsub.f32 0.0, %v1001_v2  ;;  %v1966_v22 = vpop.eup %1680  ;;  %1684 = vpow2.f32 %v1088_v16 }
  0xce   : > { %v569_v51 = vpop.f32.mrf.mxu3  ;;  %v638_v58 = vmax.f32 %v480_v45, 0.0  ;;  %v933_v62 = vrot.slane %v932_v56, 4  ;;  %v1968_v27 = vpop.eup %1682  ;;  %v1121_v39 = vmul.f32 %v1966_v22, %v1952_v50  ;;  %vm1126_vm2 = vweird.f32 %v1966_v22 }
  0xcf   : > { %v1948_v47 = vpop.f32.mrf.mxu0  ;;  %v639_v59 = vmax.f32 %v569_v51, 0.0  ;;  %v942_v0 = vrot.slane %v941_v57, 4  ;;  %v1090_v32 = vmul.f32 1.442695, %v1065_v15  ;;  %vm1141_vm3 = vweird.f32 %v1968_v27  ;;  %vm2033_vm5 = vmor %vm1125_vm1, %vm1126_vm2 }
  0xd0   : > { %v1950_v49 = vpop.f32.mrf.mxu1  ;;  %v894_v5 = vmul.f32 %v806_v6, %v638_v58  ;;  %v934_v8 = vadd.f32 %v933_v62, %v932_v56  ;;  %v608_v62 = vmax.f32 %v1948_v47, 0.0  ;;  %vm2045_vm6 = vmor %vm1140_vm4, %vm1141_vm3 }
  0xd1   : > { %v943_v54 = vadd.f32 %v942_v0, %v941_v57  ;;  %v895_v9 = vmul.f32 %v806_v6, %v639_v59  ;;  %1686 = vpow2.f32 %v1090_v32  ;;  %v1122_v6 = vsub.f32 1.0, %v1121_v39 }
  0xd2   : > { %v935_v61 = vrot.slane %v934_v8, 2  ;;  %v1004_v18 = vadd.f32 %v1003_v40, %v894_v5  ;;  %v1131_v40 = vand.u32 2147483648, %v1952_v50  ;;  %v1144_v5 = vand.u32 2147483647, %v1954_v53 }
  0xd3   : > { %v944_v14 = vrot.slane %v943_v54, 2  ;;  %v1013_v19 = vadd.f32 %v1012_v41, %v895_v9  ;;  %v1136_v41 = vmul.f32 %v1968_v27, %v1954_v53  ;;  %v1685_v0 = vpop.eup %1684  ;;  %v864_v16 = vmul.f32 %v1906_v55, %v608_v62 }
  0xd4   : > { %v936_v20 = vadd.f32 %v935_v61, %v934_v8  ;;  %v1005_v23 = vrot.slane %v1004_v18, 4  ;;  %v1984_v2 = vor.u32 1.1754944e-38, %v1131_v40  ;;  %v1988_v61 = vor.u32 1.1754944e-38, %v1146_v36 }
  0xd5   : > { %v1960_v11 = vpop.f32.mrf.mxu2  ;;  %v945_v21 = vadd.f32 %v944_v14, %v943_v54  ;;  %v1014_v24 = vrot.slane %v1013_v19, 4  ;;  %v1137_v3 = vsub.f32 1.0, %v1136_v41  ;;  %v1992_v47 = vadd.f32 1.0, %v1685_v0  ;;  %v821_v41 = vpop.permute.xlu0 %820 }
  0xd6   : > { %v1962_v12 = vpop.f32.mrf.mxu3  ;;  %v937_v28 = vrot.slane %v936_v20, 1  ;;  %v1006_v33 = vadd.f32 %v1005_v23, %v1004_v18  ;;  %v1123_v23 = vmul.f32 %v1966_v22, %v1122_v6  ;;  %vm2070_vm9 = vcmp.eq.f32.partialorder %v1144_v5, 8.507059e+37 }
  0xd7   : > { %v445_v13 = vpop.f32.mrf.mxu0  ;;  %v946_v29 = vrot.slane %v945_v21, 1  ;;  %v1015_v25 = vadd.f32 %v1014_v24, %v1013_v19  ;;  %v1138_v24 = vmul.f32 %v1968_v27, %v1137_v3  ;;  %vm1245_vm2 = vweird.f32 %v1992_v47 }
  0xd8   : > { %v1964_v10 = vpop.f32.mrf.mxu1  ;;  %v938_v7 = vadd.f32 %v937_v28, %v936_v20  ;;  %v1007_v51 = vrot.slane %v1006_v33, 2  ;;  %v610_v56 = vmax.f32 %v445_v13, 0.0  ;;  %v609_v13 = vmax.f32 %v1950_v49, 0.0 }
  0xd9   : > { %v947_v35 = vadd.f32 %v946_v29, %v945_v21  ;;  %v1016_v59 = vrot.slane %v1015_v25, 2  ;;  %v611_v14 = vmax.f32 %v1964_v10, 0.0  ;;  %v1687_v21 = vpop.eup %1686  ;;  %v2019_v0 = vadd.f32 %v1968_v27, %v1138_v24 }
  0xda   : > { %v1058_v44 = vsub.f32 0.0, %v938_v7  ;;  %v1008_v8 = vadd.f32 %v1007_v51, %v1006_v33  ;;  %v866_v54 = vmul.f32 %v1924_v26, %v610_v56  ;;  %v865_v7 = vmul.f32 %v1906_v55, %v609_v13 }
  0xdb   : > { %v1059_v45 = vsub.f32 0.0, %v947_v35  ;;  %v1017_v15 = vadd.f32 %v1016_v59, %v1015_v25  ;;  %v640_v35 = vmax.f32 %v1960_v11, 0.0  ;;  %v641_v25 = vmax.f32 %v1962_v12, 0.0 }
  0xdc   : > { %v1076_v57 = vmul.f32 1.442695, %v1058_v44  ;;  %v1009_v28 = vrot.slane %v1008_v8, 1  ;;  %v948_v29 = vadd.f32 %v866_v54, %v864_v16  ;;  %v867_v39 = vmul.f32 %v1924_v26, %v611_v14 }
  0xdd   : > { %v1970_v37 = vpop.f32.mrf.mxu2  ;;  %v1078_v58 = vmul.f32 1.442695, %v1059_v45  ;;  %v2015_v59 = vadd.f32 %v1966_v22, %v1123_v23 }
  0xde   : > { %v1972_v38 = vpop.f32.mrf.mxu3  ;;  %1688 = vpow2.f32 %v1076_v57  ;;  %v642_v44 = vmax.f32 %v1970_v37, 0.0  ;;  %v1010_v12 = vadd.f32 %v1009_v28, %v1008_v8  ;;  %v957_v37 = vadd.f32 %v867_v39, %v865_v7 }
  0xdf   : > { %v448_v42 = vpop.f32.mrf.mxu0  ;;  %1690 = vpow2.f32 %v1078_v58  ;;  %v643_v56 = vmax.f32 %v1972_v38, 0.0  ;;  %v1143_v28 = vsel %vm2045_vm6, %v1968_v27, %v2019_v0 }
  0xe0   : > { %v537_v46 = vpop.f32.mrf.mxu1  ;;  %v612_v9 = vmax.f32 %v448_v42, 0.0  ;;  %v1018_v42 = vrot.slane %v1017_v15, 1 }
  0xe1   : > { %v613_v49 = vmax.f32 %v537_v46, 0.0  ;;  %v899_v8 = vmul.f32 %v1938_v1, %v643_v56 }
  0xe2   : > { %v868_v18 = vmul.f32 %v1922_v17, %v612_v9  ;;  %v2022_v38 = vadd.f32 %v1018_v42, %v1017_v15  ;;  %v1066_v15 = vsub.f32 0.0, %v1010_v12 }
  0xe3   : > { %v869_v55 = vmul.f32 %v1922_v17, %v613_v49  ;;  %v898_v17 = vmul.f32 %v1938_v1, %v642_v44 }
  0xe4   : > { %v1689_v40 = vpop.eup %1688  ;;  %v949_v45 = vadd.f32 %v948_v29, %v868_v18  ;;  %v896_v18 = vmul.f32 %v1957_v4, %v640_v35  ;;  %v2057_v29 = vadd.f32 1.0, %v1687_v21  ;;  %v1092_v21 = vmul.f32 1.442695, %v1066_v15 }
  0xe5   : > { %v488_v19 = vpop.f32.mrf.mxu2  ;;  %v1691_v46 = vpop.eup %1690  ;;  %v2008_v36 = vadd.f32 1.0, %v1689_v40  ;;  %v958_v54 = vadd.f32 %v957_v37, %v869_v55 }
  0xe6   : > { %v577_v20 = vpop.f32.mrf.mxu3  ;;  %v2012_v57 = vadd.f32 1.0, %v1691_v46  ;;  %v644_v26 = vmax.f32 %v488_v19, 0.0  ;;  %v897_v19 = vmul.f32 %v1957_v4, %v641_v25  ;;  %v1128_v4 = vsel %vm2033_vm5, %v1966_v22, %v2015_v59  ;;  %v826_v40 = vpop.permute.xlu0 %825 }
  0xe7   : > { %v450_v10 = vpop.f32.mrf.mxu0  ;;  %1692 = vrcp.f32 %v2008_v36  ;;  %v645_v62 = vmax.f32 %v577_v20, 0.0  ;;  %v1020_v7 = vadd.f32 %v898_v17, %v896_v18  ;;  %vm1155_vm10 = vweird.f32 %v2008_v36 }
  0xe8   : > { %v614_v32 = vmax.f32 %v450_v10, 0.0  ;;  %v539_v33 = vpop.f32.mrf.mxu1  ;;  %1694 = vrcp.f32 %v2012_v57  ;;  %v900_v1 = vmul.f32 %v821_v41, %v644_v26  ;;  %v1029_v35 = vadd.f32 %v899_v8, %v897_v19 }
  0xe9   : > { %v615_v11 = vmax.f32 %v539_v33, 0.0  ;;  %v901_v23 = vmul.f32 %v821_v41, %v645_v62  ;;  %1696 = vrcp.f32 %v1992_v47  ;;  %v1067_v33 = vsub.f32 0.0, %v2022_v38 }
  0xea   : > { %v870_v51 = vmul.f32 %v1914_v60, %v614_v32  ;;  %v1159_v56 = vand.u32 2147483647, %v2008_v36  ;;  %v1161_v55 = vand.u32 2147483648, %v2008_v36  ;;  %vm1170_vm11 = vweird.f32 %v2012_v57 }
  0xeb   : > { %v871_v13 = vmul.f32 %v1914_v60, %v615_v11  ;;  %v1030_v50 = vadd.f32 %v1029_v35, %v901_v23  ;;  %v1176_v5 = vand.u32 2147483648, %v2012_v57  ;;  %1698 = vrcp.f32 %v2057_v29 }
  0xec   : > { %v950_v58 = vadd.f32 %v949_v45, %v870_v51  ;;  %v1021_v51 = vadd.f32 %v1020_v7, %v900_v1  ;;  %vm1160_vm14 = vcmp.eq.f32.partialorder %v1159_v56, 8.507059e+37  ;;  %v1162_v16 = vor.u32 1.1754944e-38, %v1161_v55 }
  0xed   : > { %v490_v6 = vpop.f32.mrf.mxu2  ;;  %v959_v10 = vadd.f32 %v958_v54, %v871_v13  ;;  %v1693_v32 = vpop.eup %1692  ;;  %v1177_v18 = vor.u32 1.1754944e-38, %v1176_v5  ;;  %1700 = vpow2.f32 %v1092_v21  ;;  %vm1260_vm4 = vweird.f32 %v2057_v29 }
  0xee   : > { %v579_v3 = vpop.f32.mrf.mxu3  ;;  %v951_v9 = vrot.slane %v950_v58, 4  ;;  %v646_v24 = vmax.f32 %v490_v6, 0.0  ;;  %v1695_v39 = vpop.eup %1694  ;;  %v1151_v27 = vmul.f32 %v1693_v32, %v2008_v36  ;;  %vm1156_vm12 = vweird.f32 %v1693_v32 }
  0xef   : > { %v2027_v14 = vpop.f32.mrf.mxu0  ;;  %v647_v25 = vmax.f32 %v579_v3, 0.0  ;;  %v960_v42 = vrot.slane %v959_v10, 4  ;;  %v1166_v45 = vmul.f32 %v1695_v39, %v2012_v57  ;;  %vm1171_vm13 = vweird.f32 %v1695_v39  ;;  %vm1157_vm15 = vmor %vm1155_vm10, %vm1156_vm12 }
  0xf0   : > { %v2039_v20 = vpop.f32.mrf.mxu1  ;;  %v952_v49 = vadd.f32 %v951_v9, %v950_v58  ;;  %v902_v52 = vmul.f32 %v826_v40, %v646_v24  ;;  %v1152_v46 = vsub.f32 1.0, %v1151_v27  ;;  %v2084_v58 = vpop.eup %1696  ;;  %v1174_v3 = vand.u32 2147483647, %v2012_v57  ;;  %vm1172_vm0 = vmor %vm1170_vm11, %vm1171_vm13 }
  0xf1   : > { %v1167_v53 = vsub.f32 1.0, %v1166_v45  ;;  %v903_v26 = vmul.f32 %v826_v40, %v647_v25  ;;  %v961_v62 = vadd.f32 %v960_v42, %v959_v10  ;;  %v1133_v10 = vsel %vm2063_vm8, %v1984_v2, %v1128_v4  ;;  %v2114_v45 = vpop.eup %1698 }
  0xf2   : > { %v953_v41 = vrot.slane %v952_v49, 2  ;;  %v1153_v59 = vmul.f32 %v1693_v32, %v1152_v46  ;;  %v1022_v8 = vadd.f32 %v1021_v51, %v902_v52  ;;  %vm1175_vm1 = vcmp.eq.f32.partialorder %v1174_v3, 8.507059e+37 }
  0xf3   : > { %v1168_v6 = vmul.f32 %v1695_v39, %v1167_v53  ;;  %v962_v13 = vrot.slane %v961_v62, 2  ;;  %v1031_v19 = vadd.f32 %v1030_v50, %v903_v26  ;;  %v1148_v36 = vsel %vm2070_vm9, %v1988_v61, %v1143_v28  ;;  %v1701_v46 = vpop.eup %1700 }
  0xf4   : > { %v954_v37 = vadd.f32 %v953_v41, %v952_v49  ;;  %v1154_v54 = vadd.f32 %v1693_v32, %v1153_v59  ;;  %v1023_v49 = vrot.slane %v1022_v8, 4  ;;  %v1094_v2 = vmul.f32 1.442695, %v1067_v33 }
  0xf5   : > { %v2078_v11 = vpop.f32.mrf.mxu2  ;;  %v1169_v15 = vadd.f32 %v1695_v39, %v1168_v6  ;;  %v963_v23 = vadd.f32 %v962_v13, %v961_v62  ;;  %v1032_v28 = vrot.slane %v1031_v19, 4  ;;  %v2118_v21 = vmul.f32 %v2084_v58, %v1992_v47 }
  0xf6   : > { %v2080_v12 = vpop.f32.mrf.mxu3  ;;  %v955_v9 = vrot.slane %v954_v37, 1  ;;  %v1158_v1 = vsel %vm1157_vm15, %v1693_v32, %v1154_v54  ;;  %v1024_v61 = vadd.f32 %v1023_v49, %v1022_v8  ;;  %1702 = vpow2.f32 %v1094_v2 }
  0xf7   : > { %v2086_v0 = vpop.f32.mrf.mxu0  ;;  %v1163_v24 = vsel %vm1160_vm14, %v1162_v16, %v1158_v1  ;;  %v1173_v7 = vsel %vm1172_vm0, %v1695_v39, %v1169_v15  ;;  %v964_v4 = vrot.slane %v963_v23, 1  ;;  %v1033_v41 = vadd.f32 %v1032_v28, %v1031_v19 }
  0xf8   : > { %v2088_v17 = vpop.f32.mrf.mxu1  ;;  %v956_v60 = vadd.f32 %v955_v9, %v954_v37  ;;  %v2103_v32 = vsel %vm1376_vm7, %v1163_v24, %v1133_v10  ;;  %v1178_v57 = vsel %vm1175_vm1, %v1177_v18, %v1173_v7  ;;  %v1025_v40 = vrot.slane %v1024_v61, 2 }
  0xf9   : > { %v2110_v22 = vsel %vm1376_vm7, %v1178_v57, %v1148_v36  ;;  %v965_v27 = vadd.f32 %v964_v4, %v963_v23  ;;  %v1034_v52 = vrot.slane %v1033_v41, 2  ;;  %v2122_v53 = vmul.f32 %v2114_v45, %v2057_v29 }
  0xfa   : > { %v1060_v39 = vsub.f32 0.0, %v956_v60  ;;  %v1026_v50 = vadd.f32 %v1025_v40, %v1024_v61  ;;  %v616_v5 = vmax.f32 %v2027_v14, 0.0  ;;  %v618_v26 = vmax.f32 %v2086_v0, 0.0 }
  0xfb   : > { %v1061_v56 = vsub.f32 0.0, %v965_v27  ;;  %v1035_v33 = vadd.f32 %v1034_v52, %v1033_v41  ;;  %v619_v62 = vmax.f32 %v2088_v17, 0.0  ;;  %v2129_v8 = vadd.f32 1.0, %v1701_v46 }
  0xfc   : > { %v1080_v51 = vmul.f32 1.442695, %v1060_v39  ;;  %v1027_v38 = vrot.slane %v1026_v50, 1  ;;  %v1703_v3 = vpop.eup %1702  ;;  %v617_v54 = vmax.f32 %v2039_v20, 0.0  ;;  %v1242_v14 = vsub.f32 1.0, %v2118_v21 }
  0xfd   : > { %v2105_v35 = vpop.f32.mrf.mxu2  ;;  %v1036_v37 = vrot.slane %v1035_v33, 1  ;;  %v1082_v13 = vmul.f32 1.442695, %v1061_v56  ;;  %v1249_v0 = vand.u32 2147483647, %v1992_v47  ;;  %v1257_v19 = vsub.f32 1.0, %v2122_v53 }
  0xfe   : > { %v2107_v25 = vpop.f32.mrf.mxu3  ;;  %1704 = vpow2.f32 %v1080_v51  ;;  %v1028_v59 = vadd.f32 %v1027_v38, %v1026_v50  ;;  %v874_v17 = vmul.f32 %v1926_v30, %v618_v26  ;;  %v2136_v1 = vadd.f32 1.0, %v1703_v3  ;;  %v846_v26 = vpop.permute.xlu1 %845 }
  0xff   : > { %v458_v42 = vpop.f32.mrf.mxu0  ;;  %v1037_v15 = vadd.f32 %v1036_v37, %v1035_v33  ;;  %v872_v60 = vmul.f32 %v1930_v48, %v616_v5  ;;  %v875_v23 = vmul.f32 %v1926_v30, %v619_v62  ;;  %v650_v20 = vmax.f32 %v2105_v35, 0.0 }
 0x100   : > { %v547_v44 = vpop.f32.mrf.mxu1  ;;  %v620_v9 = vmax.f32 %v458_v42, 0.0  ;;  %v1068_v16 = vsub.f32 0.0, %v1028_v59  ;;  %1706 = vrcp.f32 %v2129_v8  ;;  %v873_v24 = vmul.f32 %v1930_v48, %v617_v54 }
 0x101   : > { %v621_v18 = vmax.f32 %v547_v44, 0.0  ;;  %v648_v7 = vmax.f32 %v2078_v11, 0.0  ;;  %1708 = vpow2.f32 %v1082_v13  ;;  %v1069_v4 = vsub.f32 0.0, %v1037_v15 }
 0x102   : > { %v876_v36 = vmul.f32 %v1916_v63, %v620_v9  ;;  %v1096_v2 = vmul.f32 1.442695, %v1068_v16  ;;  %v966_v61 = vadd.f32 %v874_v17, %v872_v60  ;;  %v649_v27 = vmax.f32 %v2080_v12, 0.0 }
 0x103   : > { %v877_v39 = vmul.f32 %v1916_v63, %v621_v18  ;;  %v975_v40 = vadd.f32 %v875_v23, %v873_v24  ;;  %v906_v41 = vmul.f32 %v1942_v34, %v650_v20  ;;  %v651_v48 = vmax.f32 %v2107_v25, 0.0  ;;  %v841_v63 = vpop.permute.xlu2 %840 }
 0x104   : > { %v1705_v57 = vpop.eup %1704  ;;  %v904_v44 = vmul.f32 %v1979_v43, %v648_v7  ;;  %v967_v51 = vadd.f32 %v966_v61, %v876_v36  ;;  %1710 = vpow2.f32 %v1096_v2  ;;  %v1098_v52 = vmul.f32 1.442695, %v1069_v4 }
 0x105   : > { %v498_v55 = vpop.f32.mrf.mxu2  ;;  %v2149_v42 = vadd.f32 1.0, %v1705_v57  ;;  %v976_v46 = vadd.f32 %v975_v40, %v877_v39  ;;  %v1243_v5 = vmul.f32 %v2084_v58, %v1242_v14  ;;  %1712 = vrcp.f32 %v2136_v1 }
 0x106   : > { %v2127_v6 = vpop.f32.mrf.mxu3  ;;  %v652_v30 = vmax.f32 %v498_v55, 0.0  ;;  %v2154_v38 = vpop.eup %1706  ;;  %v1038_v59 = vadd.f32 %v906_v41, %v904_v44  ;;  %v907_v37 = vmul.f32 %v1942_v34, %v651_v48  ;;  %v1251_v9 = vand.u32 2147483648, %v1992_v47 }
 0x107   : > { %v460_v49 = vpop.f32.mrf.mxu0  ;;  %v653_v56 = vmax.f32 %v2127_v6, 0.0  ;;  %v1709_v53 = vpop.eup %1708  ;;  %v1258_v13 = vmul.f32 %v2114_v45, %v1257_v19  ;;  %1714 = vrcp.f32 %v2149_v42  ;;  %v1244_v34 = vadd.f32 %v2084_v58, %v1243_v5 }
 0x108   : > { %v549_v10 = vpop.f32.mrf.mxu1  ;;  %v622_v28 = vmax.f32 %v460_v49, 0.0  ;;  %v908_v25 = vmul.f32 %v841_v63, %v652_v30  ;;  %v2165_v16 = vadd.f32 1.0, %v1709_v53  ;;  %1716 = vpow2.f32 %v1098_v52 }
 0x109   : > { %v623_v35 = vmax.f32 %v549_v10, 0.0  ;;  %v909_v18 = vmul.f32 %v841_v63, %v653_v56  ;;  %vm1246_vm3 = vweird.f32 %v2084_v58  ;;  %v1266_v17 = vand.u32 2147483648, %v2057_v29 }
 0x10a   : > { %v878_v50 = vmul.f32 %v1934_v31, %v622_v28  ;;  %v1039_v15 = vadd.f32 %v1038_v59, %v908_v25  ;;  %v1711_v14 = vpop.eup %1710  ;;  %vm1261_vm5 = vweird.f32 %v2114_v45  ;;  %v1271_v24 = vmul.f32 %v2154_v38, %v2129_v8  ;;  %vm2191_vm7 = vmor %vm1245_vm2, %vm1246_vm3 }
 0x10b   : > { %v879_v55 = vmul.f32 %v1934_v31, %v623_v35  ;;  %v905_v31 = vmul.f32 %v1979_v43, %v649_v27  ;;  %v2170_v10 = vpop.eup %1712  ;;  %v1259_v43 = vadd.f32 %v2114_v45, %v1258_v13  ;;  %vm2179_vm6 = vcmp.eq.f32.partialorder %v1249_v0, 8.507059e+37  ;;  %vm2202_vm8 = vmor %vm1260_vm4, %vm1261_vm5 }
 0x10c   : > { %v968_v33 = vadd.f32 %v967_v51, %v878_v50  ;;  %v1264_v36 = vand.u32 2147483647, %v2057_v29  ;;  %1718 = vrcp.f32 %v2165_v16  ;;  %v1252_v39 = vor.u32 1.1754944e-38, %v1251_v9 }
 0x10d   : > { %v500_v11 = vpop.f32.mrf.mxu2  ;;  %v977_v6 = vadd.f32 %v976_v46, %v879_v55  ;;  %v1047_v60 = vadd.f32 %v907_v37, %v905_v31  ;;  %v2185_v2 = vpop.eup %1714  ;;  %v2195_v0 = vadd.f32 1.0, %v1711_v14  ;;  %v1248_v35 = vsel %vm2191_vm7, %v2084_v58, %v1244_v34 }
 0x10e   : > { %v589_v12 = vpop.f32.mrf.mxu3  ;;  %v654_v21 = vmax.f32 %v500_v11, 0.0  ;;  %v969_v62 = vrot.slane %v968_v33, 4  ;;  %v1717_v28 = vpop.eup %1716  ;;  %v1267_v47 = vor.u32 1.1754944e-38, %v1266_v17  ;;  %v1263_v48 = vsel %vm2202_vm8, %v2114_v45, %v1259_v43 }
 0x10f   : > { %v655_v54 = vmax.f32 %v589_v12, 0.0  ;;  %v978_v20 = vrot.slane %v977_v6, 4  ;;  %v1048_v57 = vadd.f32 %v1047_v60, %v909_v18  ;;  %v1272_v11 = vsub.f32 1.0, %v1271_v24 }
 0x110   : > { %v910_v3 = vmul.f32 %v846_v26, %v654_v21  ;;  %v970_v23 = vadd.f32 %v969_v62, %v968_v33  ;;  %v1286_v44 = vmul.f32 %v2170_v10, %v2136_v1  ;;  %v1181_v58 = vmul.f32 %v2185_v2, %v2149_v42 }
 0x111   : > { %v911_v49 = vmul.f32 %v846_v26, %v655_v54  ;;  %v979_v30 = vadd.f32 %v978_v20, %v977_v6  ;;  %vm1265_vm9 = vcmp.eq.f32.partialorder %v1264_v36, 8.507059e+37  ;;  %1720 = vrcp.f32 %v2195_v0 }
 0x112   : > { %v1040_v19 = vadd.f32 %v1039_v15, %v910_v3  ;;  %v971_v61 = vrot.slane %v970_v23, 2  ;;  %v2214_v52 = vadd.f32 1.0, %v1717_v28  ;;  %v2216_v56 = vpop.eup %1718  ;;  %v2220_v45 = vsel %vm2179_vm6, %v1252_v39, %v1248_v35 }
 0x113   : > { %v1049_v41 = vadd.f32 %v1048_v57, %v911_v49  ;;  %v980_v29 = vrot.slane %v979_v30, 2  ;;  %v2222_v12 = vsel %vm1265_vm9, %v1267_v47, %v1263_v48  ;;  %vm1275_vm10 = vweird.f32 %v2129_v8 }
 0x114   : > { %v1041_v40 = vrot.slane %v1040_v19, 4  ;;  %v972_v51 = vadd.f32 %v971_v61, %v970_v23  ;;  %v1273_v25 = vmul.f32 %v2154_v38, %v1272_v11  ;;  %v1279_v33 = vand.u32 2147483647, %v2129_v8 }
 0x115   : > { %v1050_v63 = vrot.slane %v1049_v41, 4  ;;  %v981_v21 = vadd.f32 %v980_v29, %v979_v30  ;;  %v1287_v53 = vsub.f32 1.0, %v1286_v44  ;;  %v1182_v5 = vsub.f32 1.0, %v1181_v58 }
 0x116   : > { %v1042_v50 = vadd.f32 %v1041_v40, %v1040_v19  ;;  %v973_v46 = vrot.slane %v972_v51, 1  ;;  %v1196_v37 = vmul.f32 %v2216_v56, %v2165_v16  ;;  %1722 = vrcp.f32 %v2214_v52 }
 0x117   : > { %v1051_v59 = vadd.f32 %v1050_v63, %v1049_v41  ;;  %v982_v6 = vrot.slane %v981_v21, 1  ;;  %v1281_v3 = vand.u32 2147483648, %v2129_v8  ;;  %v1294_v54 = vand.u32 2147483647, %v2136_v1  ;;  %v2232_v31 = vpop.eup %1720 }
 0x118   : > { %v974_v55 = vadd.f32 %v973_v46, %v972_v51  ;;  %v1043_v26 = vrot.slane %v1042_v50, 2  ;;  %vm1276_vm11 = vweird.f32 %v2154_v38  ;;  %vm1290_vm12 = vweird.f32 %v2136_v1 }
 0x119   : > { %v1052_v13 = vrot.slane %v1051_v59, 2  ;;  %v1296_v15 = vand.u32 2147483648, %v2136_v1  ;;  %v983_v14 = vadd.f32 %v982_v6, %v981_v21  ;;  %v1274_v34 = vadd.f32 %v2154_v38, %v1273_v25  ;;  %vm2252_vm14 = vmor %vm1275_vm10, %vm1276_vm11 }
 0x11a   : > { %v1062_v62 = vsub.f32 0.0, %v974_v55  ;;  %v1044_v9 = vadd.f32 %v1043_v26, %v1042_v50  ;;  %v1288_v17 = vmul.f32 %v2170_v10, %v1287_v53  ;;  %v1183_v20 = vmul.f32 %v2185_v2, %v1182_v5 }
 0x11b   : > { %v1053_v23 = vadd.f32 %v1052_v13, %v1051_v59  ;;  %v1197_v19 = vsub.f32 1.0, %v1196_v37  ;;  %v1063_v49 = vsub.f32 0.0, %v983_v14  ;;  %vm2240_vm13 = vcmp.eq.f32.partialorder %v1279_v33, 8.507059e+37 }
 0x11c   : > { %v1084_v18 = vmul.f32 1.442695, %v1062_v62  ;;  %v1045_v60 = vrot.slane %v1044_v9, 1  ;;  %v1301_v24 = vmul.f32 %v2232_v31, %v2195_v0  ;;  %v2246_v57 = vpop.eup %1722  ;;  %v1282_v39 = vor.u32 1.1754944e-38, %v1281_v3 }
 0x11d   : > { %v1054_v36 = vrot.slane %v1053_v23, 1  ;;  %vm1291_vm15 = vweird.f32 %v2170_v10  ;;  %v1297_v61 = vor.u32 1.1754944e-38, %v1296_v15  ;;  %v1086_v30 = vmul.f32 1.442695, %v1063_v49 }
 0x11e   : > { %1724 = vpow2.f32 %v1084_v18  ;;  %v1046_v7 = vadd.f32 %v1045_v60, %v1044_v9  ;;  %v1278_v28 = vsel %vm2252_vm14, %v2154_v38, %v1274_v34  ;;  %v1289_v35 = vadd.f32 %v2170_v10, %v1288_v17  ;;  %vm2280_vm4 = vmor %vm1290_vm12, %vm1291_vm15 }
 0x11f   : > { %vm2261_vm0 = vcmp.eq.f32.partialorder %v1294_v54, 8.507059e+37  ;;  %v1055_v47 = vadd.f32 %v1054_v36, %v1053_v23  ;;  %v1184_v40 = vadd.f32 %v2185_v2, %v1183_v20  ;;  %vm1186_vm1 = vweird.f32 %v2185_v2 }
 0x120   : > { %v1070_v8 = vsub.f32 0.0, %v1046_v7  ;;  %v1198_v41 = vmul.f32 %v2216_v56, %v1197_v19  ;;  %1726 = vpow2.f32 %v1086_v30  ;;  %v1302_v48 = vsub.f32 1.0, %v1301_v24 }
 0x121   : > { %v1316_v11 = vmul.f32 %v2246_v57, %v2214_v52  ;;  %v1071_v44 = vsub.f32 0.0, %v1055_v47  ;;  %v2272_v58 = vsel %vm2240_vm13, %v1282_v39, %v1278_v28  ;;  %vm1185_vm2 = vweird.f32 %v2149_v42 }
 0x122   : > { %v1100_v38 = vmul.f32 1.442695, %v1070_v8  ;;  %v1191_v29 = vand.u32 2147483648, %v2149_v42  ;;  %vm1378_vm3 = vcmask 1042434   ;;  %v1189_v63 = vand.u32 2147483647, %v2149_v42  ;;  %vm2292_vm5 = vmor %vm1185_vm2, %vm1186_vm1 }
 0x123   : > { %v1102_v25 = vmul.f32 1.442695, %v1071_v44  ;;  %v1293_v33 = vsel %vm2280_vm4, %v2170_v10, %v1289_v35  ;;  %v1199_v1 = vadd.f32 %v2216_v56, %v1198_v41  ;;  %vm1201_vm6 = vweird.f32 %v2216_v56 }
 0x124   : > { %v1725_v51 = vpop.eup %1724  ;;  %1728 = vpow2.f32 %v1100_v38  ;;  %v1206_v42 = vand.u32 2147483648, %v2165_v16  ;;  %v1188_v21 = vsel %vm2292_vm5, %v2185_v2, %v1184_v40  ;;  %v1303_v53 = vmul.f32 %v2232_v31, %v1302_v48 }
 0x125   : > { %v2285_v46 = vadd.f32 1.0, %v1725_v51  ;;  %v1317_v5 = vsub.f32 1.0, %v1316_v11  ;;  %v1192_v26 = vor.u32 1.1754944e-38, %v1191_v29  ;;  %vm1200_vm7 = vweird.f32 %v2165_v16 }
 0x126   : > { %v1727_v10 = vpop.eup %1726  ;;  %v1204_v59 = vand.u32 2147483647, %v2165_v16  ;;  %vm1190_vm8 = vcmp.eq.f32.partialorder %v1189_v63, 8.507059e+37  ;;  %vm2306_vm9 = vmor %vm1200_vm7, %vm1201_vm6  ;;  %v1309_v62 = vand.u32 2147483647, %v2195_v0  ;;  %v1311_v2 = vand.u32 2147483648, %v2195_v0 }
 0x127   : > { %1730 = vrcp.f32 %v2285_v46  ;;  %v2312_v6 = vadd.f32 1.0, %v1727_v10  ;;  %v2316_v3 = vsel %vm2261_vm0, %v1297_v61, %v1293_v33  ;;  %v1193_v54 = vsel %vm1190_vm8, %v1192_v26, %v1188_v21 }
 0x128   : > { %1732 = vpow2.f32 %v1102_v25  ;;  %v1203_v16 = vsel %vm2306_vm9, %v2216_v56, %v1199_v1  ;;  %v1207_v9 = vor.u32 1.1754944e-38, %v1206_v42  ;;  %v1304_v15 = vadd.f32 %v2232_v31, %v1303_v53 }
 0x129   : > { %vm1306_vm10 = vweird.f32 %v2232_v31  ;;  %v1318_v18 = vmul.f32 %v2246_v57, %v1317_v5  ;;  %1734 = vrcp.f32 %v2312_v6  ;;  %vm1205_vm11 = vcmp.eq.f32.partialorder %v1204_v59, 8.507059e+37 }
 0x12a   : > { %v1729_v13 = vpop.eup %1728  ;;  %vm1305_vm12 = vweird.f32 %v2195_v0  ;;  %v1326_v14 = vand.u32 2147483648, %v2214_v52  ;;  %v1208_v60 = vsel %vm1205_vm11, %v1207_v9, %v1203_v16  ;;  %vm2329_vm13 = vcmp.eq.f32.partialorder %v1309_v62, 8.507059e+37 }
 0x12b   : > { %v2327_v34 = vadd.f32 1.0, %v1729_v13  ;;  %v1312_v23 = vor.u32 1.1754944e-38, %v1311_v2  ;;  %vm1320_vm14 = vweird.f32 %v2214_v52  ;;  %v1379_v19 = vsel %vm1378_vm3, %v1193_v54, %v2103_v32  ;;  %vm2336_vm15 = vmor %vm1305_vm12, %vm1306_vm10 }
 0x12c   : > { %v1324_v0 = vand.u32 2147483647, %v2214_v52  ;;  %v1308_v24 = vsel %vm2336_vm15, %v2232_v31, %v1304_v15  ;;  %v2347_v7 = vadd.f32 %v2246_v57, %v1318_v18  ;;  %vm1321_vm0 = vweird.f32 %v2246_v57 }
 0x12d   : > { %v1731_v17 = vpop.eup %1730  ;;  %1736 = vrcp.f32 %v2327_v34  ;;  %v1391_v36 = vsel %vm1378_vm3, %v1208_v60, %v2110_v22  ;;  %v2354_v4 = vor.u32 1.1754944e-38, %v1326_v14  ;;  %vm1380_vm1 = vcmask 1043459   ;;  %vm2363_vm4 = vmor %vm1320_vm14, %vm1321_vm0 }
 0x12e   : > { %v1733_v20 = vpop.eup %1732  ;;  %v1211_v43 = vmul.f32 %v1731_v17, %v2285_v46  ;;  %v1219_v30 = vand.u32 2147483647, %v2285_v46  ;;  %v1221_v31 = vand.u32 2147483648, %v2285_v46  ;;  %vm1382_vm2 = vcmask 1044484  }
 0x12f   : > { %v2350_v32 = vadd.f32 1.0, %v1733_v20  ;;  %v1735_v61 = vpop.eup %1734  ;;  %v1313_v28 = vsel %vm2329_vm13, %v1312_v23, %v1308_v24  ;;  %vm1216_vm3 = vweird.f32 %v1731_v17  ;;  %v1323_v8 = vsel %vm2363_vm4, %v2246_v57, %v2347_v7 }
 0x130   : > { %v1212_v39 = vsub.f32 1.0, %v1211_v43  ;;  %v1226_v27 = vmul.f32 %v1735_v61, %v2312_v6  ;;  %v1234_v47 = vand.u32 2147483647, %v2312_v6  ;;  %vm1384_vm5 = vcmask 1045509  }
 0x131   : > { %1738 = vrcp.f32 %v2350_v32  ;;  %vm1386_vm6 = vcmask 1046534   ;;  %vm1215_vm7 = vweird.f32 %v2285_v46  ;;  %v1236_v11 = vand.u32 2147483648, %v2312_v6 }
 0x132   : > { %v1213_v22 = vmul.f32 %v1731_v17, %v1212_v39  ;;  %v1227_v48 = vsub.f32 1.0, %v1226_v27  ;;  %vm1217_vm8 = vmor %vm1215_vm7, %vm1216_vm3  ;;  %vm1220_vm9 = vcmp.eq.f32.partialorder %v1219_v30, 8.507059e+37  ;;  %v1222_v38 = vor.u32 1.1754944e-38, %v1221_v31 }
 0x133   : > { %v1737_v40 = vpop.eup %1736  ;;  %vm1388_vm10 = vcmask 1047559   ;;  %vm1230_vm11 = vweird.f32 %v2312_v6  ;;  %vm1231_vm12 = vweird.f32 %v1735_v61  ;;  %vm2383_vm13 = vcmp.eq.f32.partialorder %v1234_v47, 8.507059e+37 }
 0x134   : > { %v1214_v41 = vadd.f32 %v1731_v17, %v1213_v22  ;;  %v1331_v44 = vmul.f32 %v1737_v40, %v2327_v34  ;;  %v1228_v51 = vmul.f32 %v1735_v61, %v1227_v48  ;;  %v1341_v25 = vand.u32 2147483648, %v2327_v34  ;;  %vm1232_vm14 = vmor %vm1230_vm11, %vm1231_vm12 }
 0x135   : > { %v1237_v1 = vor.u32 1.1754944e-38, %v1236_v11  ;;  %vm1336_vm15 = vweird.f32 %v1737_v40  ;;  %v1339_v5 = vand.u32 2147483647, %v2327_v34  ;;  %vm1335_vm0 = vweird.f32 %v2327_v34 }
 0x136   : > { %v1218_v57 = vsel %vm1217_vm8, %v1731_v17, %v1214_v41  ;;  %v1332_v46 = vsub.f32 1.0, %v1331_v44  ;;  %v1229_v55 = vadd.f32 %v1735_v61, %v1228_v51  ;;  %v1342_v2 = vor.u32 1.1754944e-38, %v1341_v25  ;;  %vm1337_vm4 = vmor %vm1335_vm0, %vm1336_vm15 }
 0x137   : > { %v1739_v29 = vpop.eup %1738  ;;  %v1223_v50 = vsel %vm1220_vm9, %v1222_v38, %v1218_v57  ;;  %v1354_v16 = vand.u32 2147483647, %v2350_v32  ;;  %vm1340_vm7 = vcmp.eq.f32.partialorder %v1339_v5, 8.507059e+37  ;;  %vm1350_vm8 = vweird.f32 %v2350_v32 }
 0x138   : > { %v1381_v33 = vsel %vm1380_vm1, %v1223_v50, %v1379_v19  ;;  %v1346_v42 = vmul.f32 %v1739_v29, %v2350_v32  ;;  %v1333_v53 = vmul.f32 %v1737_v40, %v1332_v46  ;;  %v1233_v10 = vsel %vm1232_vm14, %v1735_v61, %v1229_v55 }
 0x139   : > { %v1383_v21 = vsel %vm1382_vm2, %v2220_v45, %v1381_v33  ;;  %v1238_v37 = vsel %vm2383_vm13, %v1237_v1, %v1233_v10  ;;  %v1356_v45 = vand.u32 2147483648, %v2350_v32  ;;  %vm1351_vm3 = vweird.f32 %v1739_v29 }
 0x13a   : > { %v1385_v26 = vsel %vm1384_vm5, %v2272_v58, %v1383_v21  ;;  %v1347_v59 = vsub.f32 1.0, %v1346_v42  ;;  %v1334_v62 = vadd.f32 %v1737_v40, %v1333_v53  ;;  %v1392_v6 = vsel %vm1380_vm1, %v1238_v37, %v1391_v36 }
 0x13b   : > { %v1393_v9 = vsel %vm1382_vm2, %v2222_v12, %v1392_v6  ;;  %v1387_v15 = vsel %vm1386_vm6, %v1313_v28, %v1385_v26  ;;  %vm1325_vm1 = vcmp.eq.f32.partialorder %v1324_v0, 8.507059e+37  ;;  %vm1352_vm2 = vmor %vm1350_vm8, %vm1351_vm3  ;;  %v1357_v34 = vor.u32 1.1754944e-38, %v1356_v45 }
 0x13c   : > { %v1348_v54 = vmul.f32 %v1739_v29, %v1347_v59  ;;  %v1338_v58 = vsel %vm1337_vm4, %v1737_v40, %v1334_v62  ;;  %v1394_v14 = vsel %vm1384_vm5, %v2316_v3, %v1393_v9  ;;  %v1328_v17 = vsel %vm1325_vm1, %v2354_v4, %v1323_v8 }
 0x13d   : > { %v1343_v13 = vsel %vm1340_vm7, %v1342_v2, %v1338_v58  ;;  %vm1355_vm9 = vcmp.eq.f32.partialorder %v1354_v16, 8.507059e+37  ;;  %v1395_v23 = vsel %vm1386_vm6, %v1328_v17, %v1394_v14 }
 0x13e   : > { %v1349_v18 = vadd.f32 %v1739_v29, %v1348_v54  ;;  %v1389_v12 = vsel %vm1388_vm10, %v1343_v13, %v1387_v15 }
 0x13f   : > { %1399 = vst [vmem:[%s238_s9] sm:$0xff] %v1389_v12 }
 0x140   : > { %v1353_v60 = vsel %vm1352_vm2, %v1739_v29, %v1349_v18 }
 0x141   : > { %v1358_v56 = vsel %vm1355_vm9, %v1357_v34, %v1353_v60 }
 0x142   : > { %v1396_v20 = vsel %vm1388_vm10, %v1358_v56, %v1395_v23 }
 0x143   : > { %1400 = vst [vmem:[%s238_s9 + $0x8] sm:$0xff] %v1396_v20 }
 0x144 PF: > { %s13_s14 = sadd.s32 1, %s1762_s14   ;;  %s2464_s12 = smov %s1758_s13 }
 0x145   : > { %p10_p6 = scmp.ge.s32.totalorder %s13_s14, 4   ;;  %s2465_s13 = smov %s2467_s15 }
 0x147   :  { %12 = sbr.rel (!%p10_p6) target bundleno = 2 (0x2), region = 68 }

</bundles_post_ra>
